<compile_context>
chip_gen: v7x
topology: tpu7x:2x2x1
jax: 0.10.0
libtpu: 0.0.40
codegen_flags: <defaults>
</compile_context>

<pallas_src>
import numpy as np
import jax
import jax.numpy as jnp
from jax import lax
from jax.experimental import pallas as pl
from jax.experimental.pallas import tpu as pltpu


def _make_loss_kernel(W, HW, NC, P, mask_tail):
    """Build the kernel for blocks of P flattened (H*W) planes."""

    def kernel(pred_ref, gt_ref, colm_ref, rowm_ref, sq_ref, gd_ref):
        pp = pred_ref[...].astype(jnp.float32)   # (P, HW)
        gp = gt_ref[...].astype(jnp.float32)

        if mask_tail:
            # Zero out planes past NC in the (possibly overhanging) last block.
            plane = (pl.program_id(0) * P
                     + lax.broadcasted_iota(jnp.int32, (P, 1), 0))
            valid = plane < NC
            pp = jnp.where(valid, pp, 0.0)
            gp = jnp.where(valid, gp, 0.0)

        col_m = colm_ref[...]    # (1, HW): 0.0 where j == 0, else 1.0
        row_m = rowm_ref[...]    # (1, HW): 0.0 where i == 0, else 1.0

        def tgrad(x):
            # left neighbor x[i, j-1] (zero at j == 0): lane roll by 1, masked.
            xl = pltpu.roll(x, shift=1, axis=1) * col_m
            # up neighbor x[i-1, j] (zero at i == 0): lane roll by W, masked.
            # (rolls wrap within each plane row; wrapped lanes are masked.)
            xu = pltpu.roll(x, shift=W, axis=1) * row_m
            return jnp.abs(xl - x) + jnp.abs(xu - x)

        diff = pp - gp
        sq_ref[0] = jnp.sum(diff * diff, keepdims=True)
        gd_ref[0] = jnp.sum(jnp.abs(tgrad(pp) - tgrad(gp)), keepdims=True)

    return kernel


def loss_basic(pred, ground_truth, *, target_block_bytes=4 * 1024 * 1024):
    """Pallas implementation of LossBasic.forward (gradient_L1=True)."""
    assert pred.shape == ground_truth.shape
    N, C, H, W = pred.shape
    NC, HW = N * C, H * W

    # Free metadata reshapes: (N, C, H, W) -> (N*C, H*W). No pad, no copy.
    pred2 = pred.reshape(NC, HW)
    gt2 = ground_truth.reshape(NC, HW)

    # Tiny constant boundary masks in the flattened lane layout.
    hw_idx = np.arange(HW, dtype=np.int64)
    col_mask = jnp.asarray(hw_idx % W != 0, dtype=jnp.float32).reshape(1, HW)
    row_mask = jnp.asarray(hw_idx >= W, dtype=jnp.float32).reshape(1, HW)

    # Planes per grid step: ~4 MiB per input block.
    rows = max(1, target_block_bytes // (HW * 4))
    if rows >= NC:
        P = NC                              # single block: block dims == array dims
    else:
        P = max(8, (rows // 8) * 8)         # sublane-aligned partial blocks
    G = pl.cdiv(NC, P)
    mask_tail = (NC % P) != 0

    kernel = _make_loss_kernel(W, HW, NC, P, mask_tail)

    cost = pl.CostEstimate(
        flops=20 * NC * HW,
        transcendentals=0,
        bytes_accessed=2 * NC * HW * 4 + 2 * G * 4,
    )

    sq_part, gd_part = pl.pallas_call(
        kernel,
        out_shape=(
            jax.ShapeDtypeStruct((G, 1, 1), jnp.float32),
            jax.ShapeDtypeStruct((G, 1, 1), jnp.float32),
        ),
        grid_spec=pltpu.PrefetchScalarGridSpec(
            num_scalar_prefetch=0,
            grid=(G,),
            in_specs=[
                pl.BlockSpec((P, HW), lambda i: (i, 0)),
                pl.BlockSpec((P, HW), lambda i: (i, 0)),
                pl.BlockSpec((1, HW), lambda i: (0, 0)),
                pl.BlockSpec((1, HW), lambda i: (0, 0)),
            ],
            out_specs=[
                pl.BlockSpec((1, 1, 1), lambda i: (i, 0, 0)),
                pl.BlockSpec((1, 1, 1), lambda i: (i, 0, 0)),
            ],
        ),
        compiler_params=pltpu.CompilerParams(
            dimension_semantics=("parallel",),   # per-block partials, no carry
        ),
        cost_estimate=cost,
    )(pred2, gt2, col_mask, row_mask)

    n_elems = jnp.float32(NC * HW)
    # mean(sq err) + mean(|grad diff|); both means are over N*C*H*W elements.
    return (jnp.sum(sq_part) + jnp.sum(gd_part)) / n_elems


def _reference_loss(pred, gt):
    """Pure-JAX reference mirroring the PyTorch module exactly."""
    def grad(img):
        w, h = img.shape[-2], img.shape[-1]
        l = jnp.pad(img, ((0, 0), (0, 0), (0, 0), (1, 0)))
        r = jnp.pad(img, ((0, 0), (0, 0), (0, 0), (0, 1)))
        u = jnp.pad(img, ((0, 0), (0, 0), (1, 0), (0, 0)))
        d = jnp.pad(img, ((0, 0), (0, 0), (0, 1), (0, 0)))
        return (jnp.abs((l - r)[..., :w, :h])
                + jnp.abs((u - d)[..., :w, :h]))

    mse = jnp.mean((pred - gt) ** 2)
    l1 = jnp.mean(jnp.abs(grad(pred) - grad(gt)))
    return mse + l1


if __name__ == "__main__":
    key = jax.random.PRNGKey(0)
    k1, k2 = jax.random.split(key)
    pred = jax.random.normal(k1, (2, 4, 16, 16), dtype=jnp.float32)
    gt = jax.random.normal(k2, (2, 4, 16, 16), dtype=jnp.float32)

    out = jax.jit(loss_basic)(pred, gt)
    out = jax.block_until_ready(out)

    ref = jax.block_until_ready(_reference_loss(pred, gt))
    if not jnp.allclose(out, ref, rtol=1e-5, atol=1e-6):
        raise AssertionError(f"mismatch: pallas={out} ref={ref}")

    print("KERNEL_OK")
</pallas_src>

<mosaic_0001>
module attributes {stable_mosaic.version = 11 : i64} {
  func.func @kernel(%arg0: i32, %arg1: memref<8x256xf32, #tpu.memory_space<vmem>>, %arg2: memref<8x256xf32, #tpu.memory_space<vmem>>, %arg3: memref<1x256xf32, #tpu.memory_space<vmem>>, %arg4: memref<1x256xf32, #tpu.memory_space<vmem>>, %arg5: memref<1x1x1xf32, #tpu.memory_space<vmem>>, %arg6: memref<1x1x1xf32, #tpu.memory_space<vmem>>) attributes {dimension_semantics = [#tpu.dimension_semantics<parallel>], iteration_bounds = array<i64: 1>, scalar_prefetch = 0 : i64, scratch_operands = 0 : i64, tpu.core_type = #tpu.core_type<tc>, window_params = [{transform_indices = @transform_0, window_bounds = array<i64: 8, 256>}, {transform_indices = @transform_1, window_bounds = array<i64: 8, 256>}, {pipeline_mode = #tpu.pipeline_mode<synchronous>, transform_indices = @transform_2, window_bounds = array<i64: 1, 256>}, {pipeline_mode = #tpu.pipeline_mode<synchronous>, transform_indices = @transform_3, window_bounds = array<i64: 1, 256>}, {transform_indices = @transform_4, window_bounds = array<i64: 1, 1, 1>}, {transform_indices = @transform_5, window_bounds = array<i64: 1, 1, 1>}]} {
    %c0 = arith.constant 0 : index
    %c0_0 = arith.constant 0 : index
    %0 = vector.load %arg1[%c0, %c0_0] : memref<8x256xf32, #tpu.memory_space<vmem>>, vector<8x256xf32>
    %c0_1 = arith.constant 0 : index
    %c0_2 = arith.constant 0 : index
    %1 = vector.load %arg2[%c0_1, %c0_2] : memref<8x256xf32, #tpu.memory_space<vmem>>, vector<8x256xf32>
    %c0_3 = arith.constant 0 : index
    %c0_4 = arith.constant 0 : index
    %2 = vector.load %arg3[%c0_3, %c0_4] : memref<1x256xf32, #tpu.memory_space<vmem>>, vector<1x256xf32>
    %c0_5 = arith.constant 0 : index
    %c0_6 = arith.constant 0 : index
    %3 = vector.load %arg4[%c0_5, %c0_6] : memref<1x256xf32, #tpu.memory_space<vmem>>, vector<1x256xf32>
    %4 = arith.subf %0, %1 : vector<8x256xf32>
    %5 = arith.mulf %4, %4 : vector<8x256xf32>
    %6 = vector.shape_cast %5 : vector<8x256xf32> to vector<1x8x256xf32>
    %cst = arith.constant dense<0.000000e+00> : vector<1xf32>
    %7 = vector.multi_reduction <add>, %6, %cst [1, 2] : vector<1x8x256xf32> to vector<1xf32>
    %8 = vector.shape_cast %7 : vector<1xf32> to vector<1x1x1xf32>
    %9 = vector.extract %8[0, 0, 0] : f32 from vector<1x1x1xf32>
    %10 = vector.broadcast %9 : f32 to vector<1x1xf32>
    %c0_7 = arith.constant 0 : index
    %c0_8 = arith.constant 0 : index
    %c0_9 = arith.constant 0 : index
    %11 = vector.load %arg5[%c0_7, %c0_8, %c0_9] : memref<1x1x1xf32, #tpu.memory_space<vmem>>, vector<1x1x1xf32>
    %12 = vector.shape_cast %11 : vector<1x1x1xf32> to vector<1x1xf32>
    %13 = vector.shape_cast %10 : vector<1x1xf32> to vector<1x1x1xf32>
    tpu.vector_store %arg5[%c0_7, %c0_8, %c0_9], %13 {strides = array<i32>} : memref<1x1x1xf32, #tpu.memory_space<vmem>>, vector<1x1x1xf32>,
    %c1_i32 = arith.constant 1 : i32
    %14 = tpu.dynamic_rotate %0 by %c1_i32 dim 1 : vector<8x256xf32>, i32 -> vector<8x256xf32>
    %15 = vector.broadcast %2 : vector<1x256xf32> to vector<8x256xf32>
    %16 = arith.mulf %14, %15 : vector<8x256xf32>
    %c16_i32 = arith.constant 16 : i32
    %17 = tpu.dynamic_rotate %0 by %c16_i32 dim 1 : vector<8x256xf32>, i32 -> vector<8x256xf32>
    %18 = vector.broadcast %3 : vector<1x256xf32> to vector<8x256xf32>
    %19 = arith.mulf %17, %18 : vector<8x256xf32>
    %20 = arith.subf %16, %0 : vector<8x256xf32>
    %21 = math.absf %20 : vector<8x256xf32>
    %22 = arith.subf %19, %0 : vector<8x256xf32>
    %23 = math.absf %22 : vector<8x256xf32>
    %24 = arith.addf %21, %23 : vector<8x256xf32>
    %c1_i32_10 = arith.constant 1 : i32
    %25 = tpu.dynamic_rotate %1 by %c1_i32_10 dim 1 : vector<8x256xf32>, i32 -> vector<8x256xf32>
    %26 = vector.broadcast %2 : vector<1x256xf32> to vector<8x256xf32>
    %27 = arith.mulf %25, %26 : vector<8x256xf32>
    %c16_i32_11 = arith.constant 16 : i32
    %28 = tpu.dynamic_rotate %1 by %c16_i32_11 dim 1 : vector<8x256xf32>, i32 -> vector<8x256xf32>
    %29 = vector.broadcast %3 : vector<1x256xf32> to vector<8x256xf32>
    %30 = arith.mulf %28, %29 : vector<8x256xf32>
    %31 = arith.subf %27, %1 : vector<8x256xf32>
    %32 = math.absf %31 : vector<8x256xf32>
    %33 = arith.subf %30, %1 : vector<8x256xf32>
    %34 = math.absf %33 : vector<8x256xf32>
    %35 = arith.addf %32, %34 : vector<8x256xf32>
    %36 = arith.subf %24, %35 : vector<8x256xf32>
    %37 = math.absf %36 : vector<8x256xf32>
    %38 = vector.shape_cast %37 : vector<8x256xf32> to vector<1x8x256xf32>
    %cst_12 = arith.constant dense<0.000000e+00> : vector<1xf32>
    %39 = vector.multi_reduction <add>, %38, %cst_12 [1, 2] : vector<1x8x256xf32> to vector<1xf32>
    %40 = vector.shape_cast %39 : vector<1xf32> to vector<1x1x1xf32>
    %41 = vector.extract %40[0, 0, 0] : f32 from vector<1x1x1xf32>
    %42 = vector.broadcast %41 : f32 to vector<1x1xf32>
    %c0_13 = arith.constant 0 : index
    %c0_14 = arith.constant 0 : index
    %c0_15 = arith.constant 0 : index
    %43 = vector.load %arg6[%c0_13, %c0_14, %c0_15] : memref<1x1x1xf32, #tpu.memory_space<vmem>>, vector<1x1x1xf32>
    %44 = vector.shape_cast %43 : vector<1x1x1xf32> to vector<1x1xf32>
    %45 = vector.shape_cast %42 : vector<1x1xf32> to vector<1x1x1xf32>
    tpu.vector_store %arg6[%c0_13, %c0_14, %c0_15], %45 {strides = array<i32>} : memref<1x1x1xf32, #tpu.memory_space<vmem>>, vector<1x1x1xf32>,
    return
  }
  func.func @transform_0(%arg0: i32) -> (i32, i32) {
    %c0_i32 = arith.constant 0 : i32
    %c0_i32_0 = arith.constant 0 : i32
    return %arg0, %c0_i32 : i32, i32
  }
  func.func @transform_1(%arg0: i32) -> (i32, i32) {
    %c0_i32 = arith.constant 0 : i32
    %c0_i32_0 = arith.constant 0 : i32
    return %arg0, %c0_i32 : i32, i32
  }
  func.func @transform_2(%arg0: i32) -> (i32, i32) {
    %c0_i32 = arith.constant 0 : i32
    %c0_i32_0 = arith.constant 0 : i32
    %c0_i32_1 = arith.constant 0 : i32
    return %c0_i32, %c0_i32_0 : i32, i32
  }
  func.func @transform_3(%arg0: i32) -> (i32, i32) {
    %c0_i32 = arith.constant 0 : i32
    %c0_i32_0 = arith.constant 0 : i32
    %c0_i32_1 = arith.constant 0 : i32
    return %c0_i32, %c0_i32_0 : i32, i32
  }
  func.func @transform_4(%arg0: i32) -> (i32, i32, i32) {
    %c0_i32 = arith.constant 0 : i32
    %c0_i32_0 = arith.constant 0 : i32
    %c0_i32_1 = arith.constant 0 : i32
    return %arg0, %c0_i32, %c0_i32_0 : i32, i32, i32
  }
  func.func @transform_5(%arg0: i32) -> (i32, i32, i32) {
    %c0_i32 = arith.constant 0 : i32
    %c0_i32_0 = arith.constant 0 : i32
    %c0_i32_1 = arith.constant 0 : i32
    return %arg0, %c0_i32, %c0_i32_0 : i32, i32, i32
  }
}

</mosaic_0001>

<bundles_post_ra>
// kernel: loss_basic.1
= control target key start
LH: loop header
LB: loop body
LE: loop exit
PB: predicated region body
PF: predicated region fallthrough
CT: control target
= control target key end

     0   :  { %11 = vsyncpa [#allocation3], 0  ;;  %s222_s20 = smov 16   ;;  %s223_s21 = smov 1   ;;  %s322_s0 = inlined_call_operand.vmem [shape: f32[8,256], index: 0, kind: input, shape index: {}]   ;;  %s323_s1 = inlined_call_operand.vmem [shape: f32[8,256], index: 1, kind: input, shape index: {}]   ;;  %s324_s2 = inlined_call_operand.vmem [shape: f32[1,256], index: 2, kind: input, shape index: {}]   ;;  %s325_s3 = inlined_call_operand.vmem [shape: f32[1,256], index: 3, kind: input, shape index: {}]   ;;  %s326_s4 = inlined_call_operand.hbm [shape: f32[1,1,1], index: 4, kind: output, shape index: {0}]   ;;  %s327_s5 = inlined_call_operand.hbm [shape: f32[1,1,1], index: 5, kind: output, shape index: {1}]  }
   0x1   :  { %v259_v0 = vld [vmem:[%s322_s0] sm:$0xff]  ;;  %v22_v1 = vld [vmem:[%s322_s0 + $0x8] sm:$0xff] }
   0x2   :  { %66 = vrot.lane.b32.xlu1 %v259_v0, %s222_s20  ;;  %44 = vrot.lane.b32.xlu0 %v259_v0, %s223_s21 }
   0x3   :  { %12 = vsyncpa [#allocation5], 0  ;;  %v269_v2 = vld [vmem:[%s323_s1 + $0x8] sm:$0xff]  ;;  %v23_v3 = vld [vmem:[%s323_s1] sm:$0xff]  ;;  %v48_v9 = vlaneseq  ;;  %vm42_vm2 = vcmask 0  }
   0x4   :  { %v27_v4 = vsub.f32 %v259_v0, %v23_v3  ;;  %v28_v5 = vsub.f32 %v22_v1, %v269_v2  ;;  %v26_v16 = vld [vmem:[%s325_s3] sm:$0x3] }
   0x5   :  { %v55_v10 = vshrl.u32 %v48_v9, 7  ;;  %v49_v11 = vand.u32 127, %v48_v9  ;;  %v25_v17 = vld [vmem:[%s324_s2] sm:$0x3]  ;;  %s224_s2 = smov [#allocation2]  }
   0x6   :  { %68 = vrot.lane.b32.xlu1 %v22_v1, %s222_s20  ;;  %46 = vrot.lane.b32.xlu0 %v22_v1, %s223_s21  ;;  %v29_v6 = vmul.f32 %v27_v4, %v27_v4  ;;  %v30_v7 = vmul.f32 %v28_v5, %v28_v5  ;;  %s144_s3 = sshll.u32 %s224_s2, 4  ;;  %s145_s3 = int_to_ptr.vmem [resolvable:$true] %s144_s3 }
   0x7   :  { %v56_v12 = vsub.s32 0, %v55_v10  ;;  %v60_v13 = vsub.s32 1, %v55_v10  ;;  %vm70_vm0 = vcmp.lt.s32.totalorder %v49_v11, 16  ;;  %vm50_vm1 = vcmp.lt.s32.totalorder %v49_v11, 1  ;;  %s174_s6 = scalar_lea.vmem %s145_s3, 16  ;;  %s178_s7 = scalar_lea.vmem %s145_s3, 32 }
   0x8   :  { %v31_v8 = vadd.f32 %v30_v7, %v29_v6  ;;  %p175_p0 = scmp.ne.s32.totalorder %s145_s3, %s174_s6  ;;  %p179_p1 = scmp.lt.s32.totalorder %s145_s3, %s145_s3 }
   0x9   :  { %v77_v18 = vrot.slane %v26_v16, %v56_v12  ;;  %v81_v19 = vrot.slane %v26_v16, %v60_v13  ;;  %v57_v21 = vrot.slane %v25_v17, %v56_v12  ;;  %v61_v22 = vrot.slane %v25_v17, %v60_v13  ;;  %p180_p2 = scmp.lt.s32.totalorder %s178_s7, %s174_s6 }
   0xa   :  { %98 = vrot.lane.b32.xlu1 %v269_v2, %s223_s21  ;;  %96 = vrot.lane.b32.xlu0 %v23_v3, %s223_s21 }
   0xb   :  { %p181_p3 = por %p180_p2, %p179_p1 }
   0xd   :  { %p182_p4 = pnand %p181_p3, %p175_p0 }
   0xe   :  { %106 = vrot.lane.b32.xlu1 %v269_v2, %s222_s20  ;;  %104 = vrot.lane.b32.xlu0 %v23_v3, %s222_s20 }
  0x2d   :  { %32 = vadd.xlane.f32.xlu0 %v31_v8 }
  0x74   :  { %v67_v14 = vpop.permute.xlu1 %66  ;;  %v45_v15 = vpop.permute.xlu0 %44 }
  0x78   :  { %v69_v20 = vpop.permute.xlu1 %68  ;;  %v47_v23 = vpop.permute.xlu0 %46 }
  0x79   :  { %v71_v24 = vsel %vm70_vm0, %v67_v14, %v69_v20  ;;  %v72_v25 = vsel %vm70_vm0, %v69_v20, %v67_v14  ;;  %v51_v26 = vsel %vm50_vm1, %v45_v15, %v47_v23  ;;  %v52_v27 = vsel %vm50_vm1, %v47_v23, %v45_v15 }
  0x7a   :  { %v84_v28 = vmul.f32 %v77_v18, %v72_v25  ;;  %v85_v29 = vmul.f32 %v81_v19, %v71_v24  ;;  %v64_v30 = vmul.f32 %v57_v21, %v52_v27  ;;  %v65_v31 = vmul.f32 %v61_v22, %v51_v26 }
  0x7c   :  { %v99_v32 = vpop.permute.xlu1 %98  ;;  %v97_v33 = vpop.permute.xlu0 %96  ;;  %v90_v37 = vsub.f32 %v84_v28, %v259_v0  ;;  %v91_v38 = vsub.f32 %v85_v29, %v22_v1  ;;  %v86_v40 = vsub.f32 %v64_v30, %v259_v0  ;;  %v87_v41 = vsub.f32 %v65_v31, %v22_v1 }
  0x7d   :  { %v100_v34 = vsel %vm50_vm1, %v97_v33, %v99_v32  ;;  %v101_v35 = vsel %vm50_vm1, %v99_v32, %v97_v33 }
  0x7e   :  { %v102_v36 = vmul.f32 %v101_v35, %v57_v21  ;;  %v103_v39 = vmul.f32 %v100_v34, %v61_v22  ;;  %v92_v50 = vand.u32 2147483647, %v90_v37  ;;  %v93_v51 = vand.u32 2147483647, %v91_v38 }
  0x7f   :  { %v88_v52 = vand.u32 2147483647, %v86_v40  ;;  %v89_v53 = vand.u32 2147483647, %v87_v41 }
  0x80   :  { %v107_v42 = vpop.permute.xlu1 %106  ;;  %v105_v43 = vpop.permute.xlu0 %104  ;;  %v112_v44 = vsub.f32 %v102_v36, %v23_v3  ;;  %v113_v47 = vsub.f32 %v103_v39, %v269_v2 }
  0x81   :  { %v108_v45 = vsel %vm70_vm0, %v105_v43, %v107_v42  ;;  %v109_v46 = vsel %vm70_vm0, %v107_v42, %v105_v43  ;;  %v94_v60 = vadd.f32 %v92_v50, %v88_v52  ;;  %v95_v61 = vadd.f32 %v93_v51, %v89_v53 }
  0x82   :  { %v110_v48 = vmul.f32 %v109_v46, %v77_v18  ;;  %v111_v49 = vmul.f32 %v108_v45, %v81_v19  ;;  %v114_v56 = vand.u32 2147483647, %v112_v44  ;;  %v115_v57 = vand.u32 2147483647, %v113_v47 }
  0x84   :  { %v116_v54 = vsub.f32 %v110_v48, %v23_v3  ;;  %v117_v55 = vsub.f32 %v111_v49, %v269_v2 }
  0x86   :  { %v118_v58 = vand.u32 2147483647, %v116_v54  ;;  %v119_v59 = vand.u32 2147483647, %v117_v55 }
  0x88   :  { %v120_v62 = vadd.f32 %v118_v58, %v114_v56  ;;  %v121_v63 = vadd.f32 %v119_v59, %v115_v57 }
  0x8a   :  { %v122_v0 = vsub.f32 %v94_v60, %v120_v62  ;;  %v123_v1 = vsub.f32 %v95_v61, %v121_v63 }
  0x8c   :  { %v124_v4 = vand.u32 2147483647, %v122_v0  ;;  %v125_v5 = vand.u32 2147483647, %v123_v1 }
  0x8e   :  { %v126_v6 = vadd.f32 %v125_v5, %v124_v4 }
  0x90   :  { %127 = vadd.xlane.f32.xlu1 %v126_v6 }
  0xba   :  { %v33_v7 = vpop.xlane.xlu0 %32 }
  0xbb   :  { %v34_v8 = vrot.slane %v33_v7, 4 }
  0xbd   :  { %v35_v9 = vadd.f32 %v34_v8, %v33_v7 }
  0xbf   :  { %v36_v3 = vrot.slane %v35_v9, 2 }
  0xc1   :  { %v37_v10 = vadd.f32 %v36_v3, %v35_v9 }
  0xc3   :  { %v38_v2 = vrot.slane %v37_v10, 1 }
  0xc5   :  { %v39_v11 = vadd.f32 %v38_v2, %v37_v10 }
  0xc7   :  { %166 = vpush %v39_v11 }
  0xf8   :  { %s167_s30 = spop %166 }
  0xf9   :  { %v41_v12 = vstv %s167_s30 }
  0xfa   :  { %43 = vst.msk [vmem:[#allocation2] sm:$0x1] %vm42_vm2, %v41_v12 }
  0xfb   :  { %185 = shalt.err (!%p182_p4)
}
  0xfc   :  { %s186_s10 = scalar_lea.hbm %s326_s4, 16 }
  0xfd   :  { %p187_p5 = scmp.ne.s32.totalorder %s326_s4, %s186_s10  ;;  %p190_p6 = scmp.lt.u32.totalorder %s186_s10, %s326_s4 }
  0xff   :  { %p192_p7 = pnand %p190_p6, %p187_p5 }
 0x101   :  { %195 = shalt.err (!%p192_p7)
}
 0x102   :  { %147 = dma.vmem_to_hbm [thread:$0]  %s145_s3, 16, %s326_s4, [#allocation3]  }
 0x103   :  { %s225_s17 = smov [#allocation4]  }
 0x104   :  { %s154_s18 = sshll.u32 %s225_s17, 4  ;;  %s155_s18 = int_to_ptr.vmem [resolvable:$true] %s154_s18 }
 0x105   :  { %s196_s20 = scalar_lea.vmem %s155_s18, 16  ;;  %s200_s21 = scalar_lea.vmem %s155_s18, 32 }
 0x106   :  { %p197_p8 = scmp.ne.s32.totalorder %s155_s18, %s196_s20  ;;  %p201_p9 = scmp.lt.s32.totalorder %s155_s18, %s155_s18 }
 0x107   :  { %p202_p10 = scmp.lt.s32.totalorder %s200_s21, %s196_s20 }
 0x109   :  { %p203_p11 = por %p202_p10, %p201_p9 }
 0x10b   :  { %p204_p12 = pnand %p203_p11, %p197_p8 }
 0x11d   :  { %v128_v13 = vpop.xlane.xlu1 %127 }
 0x11e   :  { %v129_v14 = vrot.slane %v128_v13, 4 }
 0x120   :  { %v130_v15 = vadd.f32 %v129_v14, %v128_v13 }
 0x122   :  { %v131_v16 = vrot.slane %v130_v15, 2 }
 0x124   :  { %v132_v17 = vadd.f32 %v131_v16, %v130_v15 }
 0x126   :  { %v133_v18 = vrot.slane %v132_v17, 1 }
 0x128   :  { %v134_v19 = vadd.f32 %v133_v18, %v132_v17 }
 0x12a   :  { %168 = vpush %v134_v19 }
 0x15b   :  { %s169_s19 = spop %168 }
 0x15c   :  { %v136_v20 = vstv %s169_s19 }
 0x15d   :  { %137 = vst.msk [vmem:[#allocation4] sm:$0x1] %vm42_vm2, %v136_v20 }
 0x15e   :  { %207 = shalt.err (!%p204_p12)
}
 0x15f   :  { %s208_s23 = scalar_lea.hbm %s327_s5, 16 }
 0x160   :  { %p209_p13 = scmp.ne.s32.totalorder %s327_s5, %s208_s23  ;;  %p212_p0 = scmp.lt.u32.totalorder %s208_s23, %s327_s5 }
 0x162   :  { %p214_p1 = pnand %p212_p0, %p209_p13 }
 0x164   :  { %217 = shalt.err (!%p214_p1)
}
 0x165   :  { %157 = dma.vmem_to_hbm [thread:$0]  %s155_s18, 16, %s327_s5, [#allocation5]  }
 0x166   :  { %218 = dma.done.wait [#allocation3], 16  }
 0x167   :  { %219 = vsyncadd [#allocation3], 4294967280 }
 0x168   :  { %220 = dma.done.wait [#allocation5], 16  }
 0x169   :  { %221 = vsyncadd [#allocation5], 4294967280 }
 0x16a   :  { %164 = vsyncpa [#allocation3], 1 }
 0x16b   :  { %165 = vsyncpa [#allocation5], 1 }

</bundles_post_ra>
